<compile_context>
chip_gen: v6e
topology: v6e:2x2x1
jax: 0.10.0
libtpu: 0.0.40
codegen_flags: <defaults>
</compile_context>

<pallas_src>
import numpy as np
import jax
import jax.numpy as jnp
from jax.experimental import pallas as pl
from jax.experimental.pallas import tpu as pltpu


# ----------------------------------------------------------------------------
# Fused kernel: conv1+BN1+ReLU -> conv2+BN2+LeakyReLU -> flatten+fc1+ReLU
#               -> fc2+LeakyReLU -> fc3, all in vregs.
# ----------------------------------------------------------------------------
def hyper_expert_kernel(x2_ref, w1_ref, b1_ref, w2_ref, b2_ref,
                        fw1_ref, fb1_ref, fw2_ref, fb2_ref, fw3_ref, fb3_ref,
                        o_ref):
    # x2_ref : (bt, M*W) f32   column index m*W + w
    # w1/b1  : (M*W, M*K) bf16 / (1, M*K) f32   block-diag conv1 (+BN1, bias folded)
    # w2/b2  : (M*K, M*C2) bf16 / (1, M*C2) f32 block-diag conv2 (+BN2, bias folded)
    # fw1    : (M*C2, Hp) bf16  rows permuted to m-major (m*C2 + c)
    # fw2    : (Hp, H2p) bf16 ; fw3 : (H2p, Op) bf16 ; fb* : (1, *) f32, zero padded
    # o_ref  : (bt, Op) f32
    bf16 = jnp.bfloat16
    f32 = jnp.float32

    # conv1 (window,1) + BN1 + ReLU  -> one whole-batch block-diagonal matmul
    h = jnp.dot(x2_ref[...].astype(bf16), w1_ref[...],
                preferred_element_type=f32) + b1_ref[...]
    h = jnp.maximum(h, 0.0)
    # TODO(synk): Dropout omitted (inference / eval mode -> identity).

    # conv2 (1x1) + BN2 + LeakyReLU(0.1)
    h = jnp.dot(h.astype(bf16), w2_ref[...],
                preferred_element_type=f32) + b2_ref[...]
    h = jnp.maximum(h, 0.1 * h)                     # exact LeakyReLU(0.1)

    # torch.flatten + fc1 + ReLU : single (bt, M*C2) @ (M*C2, Hp) matmul
    z = jnp.dot(h.astype(bf16), fw1_ref[...],
                preferred_element_type=f32) + fb1_ref[...]
    z = jnp.maximum(z, 0.0)

    # fc2 + LeakyReLU(0.1)
    z = jnp.dot(z.astype(bf16), fw2_ref[...],
                preferred_element_type=f32) + fb2_ref[...]
    z = jnp.maximum(z, 0.1 * z)

    # fc3 (lane-dense padded output)
    z = jnp.dot(z.astype(bf16), fw3_ref[...],
                preferred_element_type=f32) + fb3_ref[...]
    o_ref[...] = z.astype(o_ref.dtype)


# ----------------------------------------------------------------------------
# Wrapper
# ----------------------------------------------------------------------------
def hyper_expert_forward(x, pp, *, out_dim, batch_tile=None):
    """x: (B, window, n_multiv) f32; pp: prepared (folded/padded/bf16) params."""
    B, W, M = x.shape
    MW = M * W
    MK = pp["w1bd"].shape[1]
    MC2 = pp["w2bd"].shape[1]
    Hp = pp["fw1p"].shape[1]
    H2p = pp["fw2p"].shape[1]
    Op = pp["fw3p"].shape[1]

    if batch_tile is None:
        batch_tile = B                 # single grid step at small batch
    assert B % batch_tile == 0
    nt = B // batch_tile
    # (8,128) rule: when the batch is tiled, both the x2 block (bt, M*W) and the
    # output block (bt, Op) have bt as second-to-last dim -> must be %8 == 0.
    # (Production sizing: bt >= 256 and %8==0 on v6e/v7x, >=128 on v5e; pick
    #  nt >= 2 on v7x so both TensorCores are used via the "parallel" axis.)
    assert nt == 1 or batch_tile % 8 == 0

    # (B, W, M) -> (B, M*W); column index m*W + w.  Cheap XLA op on the input.
    x2 = jnp.transpose(x, (0, 2, 1)).reshape(B, MW)

    out_padded = pl.pallas_call(
        hyper_expert_kernel,
        out_shape=jax.ShapeDtypeStruct((B, Op), jnp.float32),
        grid=(nt,),
        in_specs=[
            pl.BlockSpec((batch_tile, MW), lambda i: (i, 0)),
            # Weights/biases are grid-invariant (constant index maps) -> fetched
            # once; total footprint is ~100 KB so default double-buffering is
            # irrelevant (no need for pl.Buffered(1)).
            pl.BlockSpec((MW, MK),   lambda i: (0, 0)),
            pl.BlockSpec((1, MK),    lambda i: (0, 0)),
            pl.BlockSpec((MK, MC2),  lambda i: (0, 0)),
            pl.BlockSpec((1, MC2),   lambda i: (0, 0)),
            pl.BlockSpec((MC2, Hp),  lambda i: (0, 0)),
            pl.BlockSpec((1, Hp),    lambda i: (0, 0)),
            pl.BlockSpec((Hp, H2p),  lambda i: (0, 0)),
            pl.BlockSpec((1, H2p),   lambda i: (0, 0)),
            pl.BlockSpec((H2p, Op),  lambda i: (0, 0)),
            pl.BlockSpec((1, Op),    lambda i: (0, 0)),
        ],
        out_specs=pl.BlockSpec((batch_tile, Op), lambda i: (i, 0)),
        compiler_params=pltpu.CompilerParams(
            dimension_semantics=("parallel",),
            vmem_limit_bytes=48 * 1024 * 1024,   # fits v7x's 64 MiB VMEM
        ),
    )(x2, pp["w1bd"], pp["b1bd"], pp["w2bd"], pp["b2bd"],
      pp["fw1p"], pp["fb1p"], pp["fw2p"], pp["fb2p"], pp["fw3p"], pp["fb3p"])

    return out_padded[:, :out_dim]


# ----------------------------------------------------------------------------
# Parameters: raw (module-style, f32) and prepared (folded, padded, bf16)
# ----------------------------------------------------------------------------
def make_raw_params(key, n_kernel, window, n_multiv, hidden_size, output_size):
    ks = jax.random.split(key, 8)
    K, C2 = n_kernel, 2 * n_kernel
    conv_out = C2 * n_multiv

    # conv1: kaiming_normal_(fan_out = K*window*1); bias U(+-1/sqrt(fan_in=window))
    w1 = jax.random.normal(ks[0], (K, window), jnp.float32) * np.sqrt(2.0 / (K * window))
    b1 = jax.random.uniform(ks[1], (K,), jnp.float32,
                            -1.0 / np.sqrt(window), 1.0 / np.sqrt(window))
    # conv2 (1x1): fan_out = C2; bias U(+-1/sqrt(K))
    w2 = jax.random.normal(ks[2], (C2, K), jnp.float32) * np.sqrt(2.0 / C2)
    b2 = jax.random.uniform(ks[3], (C2,), jnp.float32,
                            -1.0 / np.sqrt(K), 1.0 / np.sqrt(K))

    def xavier(k, fan_in, fan_out):
        return jax.random.normal(k, (fan_in, fan_out), jnp.float32) * np.sqrt(2.0 / (fan_in + fan_out))

    fw1 = xavier(ks[4], conv_out, hidden_size)            # stored as (in, out)
    fb1 = jnp.zeros((hidden_size,), jnp.float32)
    fw2 = xavier(ks[5], hidden_size, hidden_size // 2)
    fb2 = jnp.zeros((hidden_size // 2,), jnp.float32)
    fw3 = xavier(ks[6], hidden_size // 2, output_size)
    fb3 = jnp.zeros((output_size,), jnp.float32)

    return dict(w1=w1, b1=b1, w2=w2, b2=b2,
                fw1=fw1, fb1=fb1, fw2=fw2, fb2=fb2, fw3=fw3, fb3=fb3,
                bn_eps=1e-5)


def prepare_params(p, n_multiv, *, lane=128):
    """Fold BN(eval)+conv-bias into weights, build block-diagonal conv weights,
    permute fc1 rows to m-major, zero-pad fc dims to lane-dense multiples of
    128, cast matmul weights to bf16."""
    # BN eval with fresh running stats: scale = 1/sqrt(var+eps) = 1/sqrt(1+eps),
    # shift = 0; applied to (conv + bias).
    s = np.float32(1.0 / np.sqrt(1.0 + p["bn_eps"]))
    K, W = p["w1"].shape
    C2 = p["w2"].shape[0]
    M = n_multiv
    H = p["fw1"].shape[1]
    H2 = p["fw2"].shape[1]
    O = p["fw3"].shape[1]

    eye = jnp.eye(M, dtype=jnp.float32)
    # Block-diagonal conv weights acting on the (B, M*W) row slab.
    w1bd = jnp.kron(eye, (p["w1"] * s).T).astype(jnp.bfloat16)      # (M*W, M*K)
    b1bd = jnp.tile(p["b1"] * s, M)[None, :].astype(jnp.float32)    # (1, M*K)
    w2bd = jnp.kron(eye, (p["w2"] * s).T).astype(jnp.bfloat16)      # (M*K, M*C2)
    b2bd = jnp.tile(p["b2"] * s, M)[None, :].astype(jnp.float32)    # (1, M*C2)

    # fc1 rows permuted from torch.flatten order (c*M + m) to slab order (m*C2 + c).
    fw1m = p["fw1"].reshape(C2, M, H).transpose(1, 0, 2).reshape(M * C2, H)

    Hp = -(-H // lane) * lane
    H2p = -(-H2 // lane) * lane
    Op = -(-O // lane) * lane

    fw1p = jnp.zeros((M * C2, Hp), jnp.float32).at[:, :H].set(fw1m).astype(jnp.bfloat16)
    fb1p = jnp.zeros((1, Hp), jnp.float32).at[0, :H].set(p["fb1"])
    fw2p = jnp.zeros((Hp, H2p), jnp.float32).at[:H, :H2].set(p["fw2"]).astype(jnp.bfloat16)
    fb2p = jnp.zeros((1, H2p), jnp.float32).at[0, :H2].set(p["fb2"])
    fw3p = jnp.zeros((H2p, Op), jnp.float32).at[:H2, :O].set(p["fw3"]).astype(jnp.bfloat16)
    fb3p = jnp.zeros((1, Op), jnp.float32).at[0, :O].set(p["fb3"])

    return dict(w1bd=w1bd, b1bd=b1bd, w2bd=w2bd, b2bd=b2bd,
                fw1p=fw1p, fb1p=fb1p, fw2p=fw2p, fb2p=fb2p,
                fw3p=fw3p, fb3p=fb3p)


# ----------------------------------------------------------------------------
# References
# ----------------------------------------------------------------------------
def reference_forward_f32(x, p):
    """Faithful f32 re-implementation of HyperExpert.forward (eval mode)."""
    s = np.float32(1.0 / np.sqrt(1.0 + p["bn_eps"]))
    h1 = jnp.einsum("kw,bwm->bkm", p["w1"], x) + p["b1"][None, :, None]
    h1 = jnp.maximum(h1 * s, 0.0)
    h2 = jnp.einsum("ck,bkm->bcm", p["w2"], h1) + p["b2"][None, :, None]
    h2 = h2 * s
    h2 = jnp.where(h2 >= 0, h2, 0.1 * h2)
    flat = h2.reshape(x.shape[0], -1)                 # torch.flatten(x, 1)
    z = jnp.maximum(flat @ p["fw1"] + p["fb1"], 0.0)
    z = z @ p["fw2"] + p["fb2"]
    z = jnp.where(z >= 0, z, 0.1 * z)
    return z @ p["fw3"] + p["fb3"]


def reference_forward_prepared(x, pp, out_dim):
    """Pure-JAX mirror of the kernel math (same folded/padded bf16 weights)."""
    bf = jnp.bfloat16
    f32 = jnp.float32
    B, W, M = x.shape
    x2 = jnp.transpose(x, (0, 2, 1)).reshape(B, M * W)
    h = jnp.dot(x2.astype(bf), pp["w1bd"], preferred_element_type=f32) + pp["b1bd"]
    h = jnp.maximum(h, 0.0)
    h = jnp.dot(h.astype(bf), pp["w2bd"], preferred_element_type=f32) + pp["b2bd"]
    h = jnp.maximum(h, 0.1 * h)
    z = jnp.dot(h.astype(bf), pp["fw1p"], preferred_element_type=f32) + pp["fb1p"]
    z = jnp.maximum(z, 0.0)
    z = jnp.dot(z.astype(bf), pp["fw2p"], preferred_element_type=f32) + pp["fb2p"]
    z = jnp.maximum(z, 0.1 * z)
    z = jnp.dot(z.astype(bf), pp["fw3p"], preferred_element_type=f32) + pp["fb3p"]
    return z[:, :out_dim]


if __name__ == "__main__":
    batch, n_kernel, window, n_multiv = 2, 4, 8, 8
    hidden_size, output_size = 32, 4

    key = jax.random.PRNGKey(0)
    kx, kp = jax.random.split(key)
    x = jax.random.normal(kx, (batch, window, n_multiv), jnp.float32)

    raw = make_raw_params(kp, n_kernel, window, n_multiv, hidden_size, output_size)
    pp = prepare_params(raw, n_multiv)

    fwd = jax.jit(hyper_expert_forward, static_argnames=("out_dim", "batch_tile"))
    out = jax.block_until_ready(fwd(x, pp, out_dim=output_size))
    assert out.shape == (batch, output_size)

    # Tight check: kernel vs identical-math JAX reference (same bf16 weights).
    ref_bf16 = jax.block_until_ready(reference_forward_prepared(x, pp, output_size))
    np.testing.assert_allclose(np.asarray(out), np.asarray(ref_bf16),
                               rtol=2e-3, atol=2e-3)

    # Structural check: kernel vs faithful f32 module forward (loose tolerance
    # only covers the intentional bf16 weight/activation quantization).
    ref_f32 = jax.block_until_ready(reference_forward_f32(x, raw))
    np.testing.assert_allclose(np.asarray(out), np.asarray(ref_f32),
                               rtol=1e-1, atol=1e-1)

    print("KERNEL_OK")
</pallas_src>

<mosaic_0001>
module attributes {stable_mosaic.version = 11 : i64} {
  func.func @hyper_expert_kernel(%arg0: i32, %arg1: memref<2x64xf32, #tpu.memory_space<vmem>>, %arg2: memref<64x32xbf16, #tpu.memory_space<vmem>>, %arg3: memref<1x32xf32, #tpu.memory_space<vmem>>, %arg4: memref<32x64xbf16, #tpu.memory_space<vmem>>, %arg5: memref<1x64xf32, #tpu.memory_space<vmem>>, %arg6: memref<64x128xbf16, #tpu.memory_space<vmem>>, %arg7: memref<1x128xf32, #tpu.memory_space<vmem>>, %arg8: memref<128x128xbf16, #tpu.memory_space<vmem>>, %arg9: memref<1x128xf32, #tpu.memory_space<vmem>>, %arg10: memref<128x128xbf16, #tpu.memory_space<vmem>>, %arg11: memref<1x128xf32, #tpu.memory_space<vmem>>, %arg12: memref<2x128xf32, #tpu.memory_space<vmem>>) attributes {dimension_semantics = [#tpu.dimension_semantics<parallel>], iteration_bounds = array<i64: 1>, scalar_prefetch = 0 : i64, scratch_operands = 0 : i64, tpu.core_type = #tpu.core_type<tc>, window_params = [{transform_indices = @transform_0, window_bounds = array<i64: 2, 64>}, {pipeline_mode = #tpu.pipeline_mode<synchronous>, transform_indices = @transform_1, window_bounds = array<i64: 64, 32>}, {pipeline_mode = #tpu.pipeline_mode<synchronous>, transform_indices = @transform_2, window_bounds = array<i64: 1, 32>}, {pipeline_mode = #tpu.pipeline_mode<synchronous>, transform_indices = @transform_3, window_bounds = array<i64: 32, 64>}, {pipeline_mode = #tpu.pipeline_mode<synchronous>, transform_indices = @transform_4, window_bounds = array<i64: 1, 64>}, {pipeline_mode = #tpu.pipeline_mode<synchronous>, transform_indices = @transform_5, window_bounds = array<i64: 64, 128>}, {pipeline_mode = #tpu.pipeline_mode<synchronous>, transform_indices = @transform_6, window_bounds = array<i64: 1, 128>}, {pipeline_mode = #tpu.pipeline_mode<synchronous>, transform_indices = @transform_7, window_bounds = array<i64: 128, 128>}, {pipeline_mode = #tpu.pipeline_mode<synchronous>, transform_indices = @transform_8, window_bounds = array<i64: 1, 128>}, {pipeline_mode = #tpu.pipeline_mode<synchronous>, transform_indices = @transform_9, window_bounds = array<i64: 128, 128>}, {pipeline_mode = #tpu.pipeline_mode<synchronous>, transform_indices = @transform_10, window_bounds = array<i64: 1, 128>}, {transform_indices = @transform_11, window_bounds = array<i64: 2, 128>}]} {
    %c0 = arith.constant 0 : index
    %c0_0 = arith.constant 0 : index
    %0 = vector.load %arg1[%c0, %c0_0] : memref<2x64xf32, #tpu.memory_space<vmem>>, vector<2x64xf32>
    %1 = arith.truncf %0 : vector<2x64xf32> to vector<2x64xbf16>
    %c0_1 = arith.constant 0 : index
    %c0_2 = arith.constant 0 : index
    %2 = vector.load %arg2[%c0_1, %c0_2] : memref<64x32xbf16, #tpu.memory_space<vmem>>, vector<64x32xbf16>
    %cst = arith.constant dense<0.000000e+00> : vector<2x32xf32>
    %3 = tpu.matmul %1, %2, %cst {dimension_numbers = #tpu.dot_dimension_numbers<[1], [0], [0], [1], [0, 0, 1, 1], [], []>} : vector<2x64xbf16>, vector<64x32xbf16>, vector<2x32xf32> -> vector<2x32xf32>
    %c0_3 = arith.constant 0 : index
    %c0_4 = arith.constant 0 : index
    %4 = vector.load %arg3[%c0_3, %c0_4] : memref<1x32xf32, #tpu.memory_space<vmem>>, vector<1x32xf32>
    %5 = vector.broadcast %4 : vector<1x32xf32> to vector<2x32xf32>
    %6 = arith.addf %3, %5 : vector<2x32xf32>
    %cst_5 = arith.constant 0.000000e+00 : f32
    %7 = vector.broadcast %cst_5 : f32 to vector<2x32xf32>
    %8 = arith.maximumf %6, %7 : vector<2x32xf32>
    %9 = arith.truncf %8 : vector<2x32xf32> to vector<2x32xbf16>
    %c0_6 = arith.constant 0 : index
    %c0_7 = arith.constant 0 : index
    %10 = vector.load %arg4[%c0_6, %c0_7] : memref<32x64xbf16, #tpu.memory_space<vmem>>, vector<32x64xbf16>
    %cst_8 = arith.constant dense<0.000000e+00> : vector<2x64xf32>
    %11 = tpu.matmul %9, %10, %cst_8 {dimension_numbers = #tpu.dot_dimension_numbers<[1], [0], [0], [1], [0, 0, 1, 1], [], []>} : vector<2x32xbf16>, vector<32x64xbf16>, vector<2x64xf32> -> vector<2x64xf32>
    %c0_9 = arith.constant 0 : index
    %c0_10 = arith.constant 0 : index
    %12 = vector.load %arg5[%c0_9, %c0_10] : memref<1x64xf32, #tpu.memory_space<vmem>>, vector<1x64xf32>
    %13 = vector.broadcast %12 : vector<1x64xf32> to vector<2x64xf32>
    %14 = arith.addf %11, %13 : vector<2x64xf32>
    %cst_11 = arith.constant 1.000000e-01 : f32
    %15 = vector.broadcast %cst_11 : f32 to vector<2x64xf32>
    %16 = arith.mulf %15, %14 : vector<2x64xf32>
    %17 = arith.maximumf %14, %16 : vector<2x64xf32>
    %18 = arith.truncf %17 : vector<2x64xf32> to vector<2x64xbf16>
    %c0_12 = arith.constant 0 : index
    %c0_13 = arith.constant 0 : index
    %19 = vector.load %arg6[%c0_12, %c0_13] : memref<64x128xbf16, #tpu.memory_space<vmem>>, vector<64x128xbf16>
    %cst_14 = arith.constant dense<0.000000e+00> : vector<2x128xf32>
    %20 = tpu.matmul %18, %19, %cst_14 {dimension_numbers = #tpu.dot_dimension_numbers<[1], [0], [0], [1], [0, 0, 1, 1], [], []>} : vector<2x64xbf16>, vector<64x128xbf16>, vector<2x128xf32> -> vector<2x128xf32>
    %c0_15 = arith.constant 0 : index
    %c0_16 = arith.constant 0 : index
    %21 = vector.load %arg7[%c0_15, %c0_16] : memref<1x128xf32, #tpu.memory_space<vmem>>, vector<1x128xf32>
    %22 = vector.broadcast %21 : vector<1x128xf32> to vector<2x128xf32>
    %23 = arith.addf %20, %22 : vector<2x128xf32>
    %cst_17 = arith.constant 0.000000e+00 : f32
    %24 = vector.broadcast %cst_17 : f32 to vector<2x128xf32>
    %25 = arith.maximumf %23, %24 : vector<2x128xf32>
    %26 = arith.truncf %25 : vector<2x128xf32> to vector<2x128xbf16>
    %c0_18 = arith.constant 0 : index
    %c0_19 = arith.constant 0 : index
    %27 = vector.load %arg8[%c0_18, %c0_19] : memref<128x128xbf16, #tpu.memory_space<vmem>>, vector<128x128xbf16>
    %cst_20 = arith.constant dense<0.000000e+00> : vector<2x128xf32>
    %28 = tpu.matmul %26, %27, %cst_20 {dimension_numbers = #tpu.dot_dimension_numbers<[1], [0], [0], [1], [0, 0, 1, 1], [], []>} : vector<2x128xbf16>, vector<128x128xbf16>, vector<2x128xf32> -> vector<2x128xf32>
    %c0_21 = arith.constant 0 : index
    %c0_22 = arith.constant 0 : index
    %29 = vector.load %arg9[%c0_21, %c0_22] : memref<1x128xf32, #tpu.memory_space<vmem>>, vector<1x128xf32>
    %30 = vector.broadcast %29 : vector<1x128xf32> to vector<2x128xf32>
    %31 = arith.addf %28, %30 : vector<2x128xf32>
    %cst_23 = arith.constant 1.000000e-01 : f32
    %32 = vector.broadcast %cst_23 : f32 to vector<2x128xf32>
    %33 = arith.mulf %32, %31 : vector<2x128xf32>
    %34 = arith.maximumf %31, %33 : vector<2x128xf32>
    %35 = arith.truncf %34 : vector<2x128xf32> to vector<2x128xbf16>
    %c0_24 = arith.constant 0 : index
    %c0_25 = arith.constant 0 : index
    %36 = vector.load %arg10[%c0_24, %c0_25] : memref<128x128xbf16, #tpu.memory_space<vmem>>, vector<128x128xbf16>
    %cst_26 = arith.constant dense<0.000000e+00> : vector<2x128xf32>
    %37 = tpu.matmul %35, %36, %cst_26 {dimension_numbers = #tpu.dot_dimension_numbers<[1], [0], [0], [1], [0, 0, 1, 1], [], []>} : vector<2x128xbf16>, vector<128x128xbf16>, vector<2x128xf32> -> vector<2x128xf32>
    %c0_27 = arith.constant 0 : index
    %c0_28 = arith.constant 0 : index
    %38 = vector.load %arg11[%c0_27, %c0_28] : memref<1x128xf32, #tpu.memory_space<vmem>>, vector<1x128xf32>
    %39 = vector.broadcast %38 : vector<1x128xf32> to vector<2x128xf32>
    %40 = arith.addf %37, %39 : vector<2x128xf32>
    %c0_29 = arith.constant 0 : index
    %c0_30 = arith.constant 0 : index
    %41 = vector.load %arg12[%c0_29, %c0_30] : memref<2x128xf32, #tpu.memory_space<vmem>>, vector<2x128xf32>
    tpu.vector_store %arg12[%c0_29, %c0_30], %40 {strides = array<i32>} : memref<2x128xf32, #tpu.memory_space<vmem>>, vector<2x128xf32>,
    return
  }
  func.func @transform_0(%arg0: i32) -> (i32, i32) {
    %c0_i32 = arith.constant 0 : i32
    %c0_i32_0 = arith.constant 0 : i32
    return %arg0, %c0_i32 : i32, i32
  }
  func.func @transform_1(%arg0: i32) -> (i32, i32) {
    %c0_i32 = arith.constant 0 : i32
    %c0_i32_0 = arith.constant 0 : i32
    %c0_i32_1 = arith.constant 0 : i32
    return %c0_i32, %c0_i32_0 : i32, i32
  }
  func.func @transform_2(%arg0: i32) -> (i32, i32) {
    %c0_i32 = arith.constant 0 : i32
    %c0_i32_0 = arith.constant 0 : i32
    %c0_i32_1 = arith.constant 0 : i32
    return %c0_i32, %c0_i32_0 : i32, i32
  }
  func.func @transform_3(%arg0: i32) -> (i32, i32) {
    %c0_i32 = arith.constant 0 : i32
    %c0_i32_0 = arith.constant 0 : i32
    %c0_i32_1 = arith.constant 0 : i32
    return %c0_i32, %c0_i32_0 : i32, i32
  }
  func.func @transform_4(%arg0: i32) -> (i32, i32) {
    %c0_i32 = arith.constant 0 : i32
    %c0_i32_0 = arith.constant 0 : i32
    %c0_i32_1 = arith.constant 0 : i32
    return %c0_i32, %c0_i32_0 : i32, i32
  }
  func.func @transform_5(%arg0: i32) -> (i32, i32) {
    %c0_i32 = arith.constant 0 : i32
    %c0_i32_0 = arith.constant 0 : i32
    %c0_i32_1 = arith.constant 0 : i32
    return %c0_i32, %c0_i32_0 : i32, i32
  }
  func.func @transform_6(%arg0: i32) -> (i32, i32) {
    %c0_i32 = arith.constant 0 : i32
    %c0_i32_0 = arith.constant 0 : i32
    %c0_i32_1 = arith.constant 0 : i32
    return %c0_i32, %c0_i32_0 : i32, i32
  }
  func.func @transform_7(%arg0: i32) -> (i32, i32) {
    %c0_i32 = arith.constant 0 : i32
    %c0_i32_0 = arith.constant 0 : i32
    %c0_i32_1 = arith.constant 0 : i32
    return %c0_i32, %c0_i32_0 : i32, i32
  }
  func.func @transform_8(%arg0: i32) -> (i32, i32) {
    %c0_i32 = arith.constant 0 : i32
    %c0_i32_0 = arith.constant 0 : i32
    %c0_i32_1 = arith.constant 0 : i32
    return %c0_i32, %c0_i32_0 : i32, i32
  }
  func.func @transform_9(%arg0: i32) -> (i32, i32) {
    %c0_i32 = arith.constant 0 : i32
    %c0_i32_0 = arith.constant 0 : i32
    %c0_i32_1 = arith.constant 0 : i32
    return %c0_i32, %c0_i32_0 : i32, i32
  }
  func.func @transform_10(%arg0: i32) -> (i32, i32) {
    %c0_i32 = arith.constant 0 : i32
    %c0_i32_0 = arith.constant 0 : i32
    %c0_i32_1 = arith.constant 0 : i32
    return %c0_i32, %c0_i32_0 : i32, i32
  }
  func.func @transform_11(%arg0: i32) -> (i32, i32) {
    %c0_i32 = arith.constant 0 : i32
    %c0_i32_0 = arith.constant 0 : i32
    return %arg0, %c0_i32 : i32, i32
  }
}

</mosaic_0001>

<bundles_post_ra>
// kernel: hyper_expert_forward.1
= control target key start
LH: loop header
LB: loop body
LE: loop exit
PB: predicated region body
PF: predicated region fallthrough
CT: control target
= control target key end

     0   :  { %16 = vsyncpa [#allocation3], 0  ;;  %s1108_s0 = inlined_call_operand.vmem [shape: f32[2,64], index: 0, kind: input, shape index: {}]   ;;  %s1109_s1 = inlined_call_operand.vmem [shape: bf16[64,32], index: 1, kind: input, shape index: {}]   ;;  %s1110_s2 = inlined_call_operand.hbm [shape: f32[1,32], index: 2, kind: input, shape index: {}]   ;;  %s1111_s3 = inlined_call_operand.vmem [shape: bf16[32,64], index: 3, kind: input, shape index: {}]   ;;  %s1112_s4 = inlined_call_operand.hbm [shape: f32[1,64], index: 4, kind: input, shape index: {}]   ;;  %s1113_s5 = inlined_call_operand.vmem [shape: bf16[64,128], index: 5, kind: input, shape index: {}]   ;;  %s1114_s6 = inlined_call_operand.hbm [shape: f32[1,128], index: 6, kind: input, shape index: {}]   ;;  %s1115_s7 = inlined_call_operand.vmem [shape: bf16[128,128], index: 7, kind: input, shape index: {}]   ;;  %s1116_s8 = inlined_call_operand.hbm [shape: f32[1,128], index: 8, kind: input, shape index: {}]   ;;  %s1117_s9 = inlined_call_operand.hbm [shape: bf16[128,128], index: 9, kind: input, shape index: {}]   ;;  %s1118_s10 = inlined_call_operand.hbm [shape: f32[1,128], index: 10, kind: input, shape index: {}]   ;;  %s1119_s11 = inlined_call_operand.hbm [shape: f32[2,128], index: 11, kind: output, shape index: {}]  }
   0x1   :  { %17 = vsyncpa [#allocation6], 0 }
   0x2   :  { %18 = vsyncpa [#allocation9], 0 }
   0x3   :  { %19 = vsyncpa [#allocation12], 0 }
   0x4   :  { %20 = vsyncpa [#allocation4], 0  ;;  %s921_s17 = smov [#allocation5]   ;;  %s922_s19 = smov [#allocation8]  }
   0x5   :  { %s43_s18 = sshll.u32 %s921_s17, 4  ;;  %s67_s20 = sshll.u32 %s922_s19, 4  ;;  %s44_s18 = int_to_ptr.vmem [resolvable:$true] %s43_s18  ;;  %s68_s20 = int_to_ptr.vmem [resolvable:$true] %s67_s20 }
   0x6   :  { %s779_s21 = scalar_lea.vmem %s44_s18, 16  ;;  %s783_s22 = scalar_lea.vmem %s44_s18, 32 }
   0x7   :  { %p780_p0 = scmp.ne.s32.totalorder %s44_s18, %s779_s21  ;;  %p784_p1 = scmp.lt.s32.totalorder %s44_s18, %s44_s18 }
   0x8   :  { %p785_p2 = scmp.lt.s32.totalorder %s783_s22, %s779_s21 }
   0xa   :  { %p786_p3 = por %p785_p2, %p784_p1 }
   0xc   :  { %p787_p4 = pnand %p786_p3, %p780_p0 }
   0xe   :  { %790 = shalt.err (!%p787_p4)
}
   0xf   :  { %46 = dma.hbm_to_vmem [thread:$0]  %s1112_s4, 16, %s44_s18, [#allocation6]  }
  0x10   :  { %s799_s25 = scalar_lea.vmem %s68_s20, 16  ;;  %s803_s26 = scalar_lea.vmem %s68_s20, 32 }
  0x11   :  { %p800_p5 = scmp.ne.s32.totalorder %s68_s20, %s799_s25  ;;  %p804_p6 = scmp.lt.s32.totalorder %s68_s20, %s68_s20 }
  0x12   :  { %p805_p7 = scmp.lt.s32.totalorder %s803_s26, %s799_s25 }
  0x14   :  { %p806_p8 = por %p805_p7, %p804_p6 }
  0x16   :  { %p807_p9 = pnand %p806_p8, %p800_p5 }
  0x18   :  { %810 = shalt.err (!%p807_p9)
}
  0x19   :  { %70 = dma.hbm_to_vmem [thread:$0]  %s1116_s8, 16, %s68_s20, [#allocation9]  }
  0x1a   :  { %s923_s29 = smov [#allocation2]   ;;  %s924_s12 = smov [#allocation7]  }
  0x1b   :  { %s31_s30 = sshll.u32 %s923_s29, 4  ;;  %s55_s13 = sshll.u32 %s924_s12, 4  ;;  %s32_s30 = int_to_ptr.vmem [resolvable:$true] %s31_s30  ;;  %s56_s13 = int_to_ptr.vmem [resolvable:$true] %s55_s13 }
  0x1c   :  { %s819_s14 = scalar_lea.vmem %s32_s30, 16  ;;  %s823_s4 = scalar_lea.vmem %s32_s30, 32 }
  0x1d   :  { %p820_p10 = scmp.ne.s32.totalorder %s32_s30, %s819_s14  ;;  %p824_p11 = scmp.lt.s32.totalorder %s32_s30, %s32_s30 }
  0x1e   :  { %p825_p12 = scmp.lt.s32.totalorder %s823_s4, %s819_s14 }
  0x20   :  { %p826_p13 = por %p825_p12, %p824_p11 }
  0x22   :  { %p827_p0 = pnand %p826_p13, %p820_p10 }
  0x24   :  { %830 = shalt.err (!%p827_p0)
}
  0x25   :  { %34 = dma.hbm_to_vmem [thread:$0]  %s1110_s2, 16, %s32_s30, [#allocation3]  }
  0x26   :  { %s839_s17 = scalar_lea.vmem %s56_s13, 16  ;;  %s843_s8 = scalar_lea.vmem %s56_s13, 32 }
  0x27   :  { %p840_p1 = scmp.ne.s32.totalorder %s56_s13, %s839_s17  ;;  %p844_p2 = scmp.lt.s32.totalorder %s56_s13, %s56_s13 }
  0x28   :  { %p845_p3 = scmp.lt.s32.totalorder %s843_s8, %s839_s17 }
  0x2a   :  { %p846_p4 = por %p845_p3, %p844_p2 }
  0x2c   :  { %p847_p5 = pnand %p846_p4, %p840_p1 }
  0x2e   :  { %850 = shalt.err (!%p847_p5)
}
  0x2f   :  { %58 = dma.hbm_to_vmem [thread:$0]  %s1114_s6, 16, %s56_s13, [#allocation6]  }
  0x30   :  { %s925_s20 = smov [#allocation10]  }
  0x31   :  { %s76_s21 = sshll.u32 %s925_s20, 4  ;;  %s77_s21 = int_to_ptr.vmem [resolvable:$true] %s76_s21 }
  0x32   :  { %s859_s22 = scalar_lea.vmem %s77_s21, 1024  ;;  %p864_p7 = scmp.lt.s32.totalorder %s77_s21, %s77_s21 }
  0x33   :  { %p860_p6 = scmp.ne.s32.totalorder %s77_s21, %s859_s22  ;;  %p865_p8 = scmp.lt.s32.totalorder %s859_s22, %s859_s22 }
  0x35   :  { %p866_p9 = por %p865_p8, %p864_p7 }
  0x37   :  { %p867_p10 = pnand %p866_p9, %p860_p6 }
  0x39   :  { %870 = shalt.err (!%p867_p10)
}
  0x3a   :  { %s926_s2 = smov 64   ;;  %s927_s23 = smov 4  }
  0x3b   :  { %82 = dma.hbm_to_vmem [thread:$0]  %s1117_s9, 1024, %s77_s21, [#allocation9], %s926_s2, %s926_s2, %s927_s23  }
  0x3c   :  { %s928_s26 = smov [#allocation11]  }
  0x3d   :  { %s89_s27 = sshll.u32 %s928_s26, 4  ;;  %s90_s27 = int_to_ptr.vmem [resolvable:$true] %s89_s27 }
  0x3e   :  { %s879_s6 = scalar_lea.vmem %s90_s27, 16  ;;  %s883_s28 = scalar_lea.vmem %s90_s27, 32 }
  0x3f   :  { %p880_p11 = scmp.ne.s32.totalorder %s90_s27, %s879_s6  ;;  %p884_p12 = scmp.lt.s32.totalorder %s90_s27, %s90_s27 }
  0x40   :  { %p885_p13 = scmp.lt.s32.totalorder %s883_s28, %s879_s6 }
  0x42   :  { %p886_p0 = por %p885_p13, %p884_p12 }
  0x44   :  { %p887_p1 = pnand %p886_p0, %p880_p11 }
  0x46   :  { %890 = shalt.err (!%p887_p1)
}
  0x47   :  { %92 = dma.hbm_to_vmem [thread:$0]  %s1118_s10, 16, %s90_s27, [#allocation12]  }
  0x48   :  { %911 = dma.done.wait [#allocation3], 16  }
  0x49   :  { %912 = vsyncadd [#allocation3], 4294967280 }
  0x4a   :  { %913 = dma.done.wait [#allocation6], 32  }
  0x4b   :  { %914 = vsyncadd [#allocation6], 4294967264 }
  0x4c   :  { %915 = dma.done.wait [#allocation9], 1040  }
  0x4d   :  { %916 = vsyncadd [#allocation9], 4294966256 }
  0x4e   :  { %917 = dma.done.wait [#allocation12], 16  }
  0x4f   :  { %918 = vsyncadd [#allocation12], 4294967280  ;;  %v929_v0 = vmov 0.0   ;;  %vm930_vm0 = vmmov 0   ;;  %v745_v1 = vld [vmem:[%s1109_s1 + $0x18] sm:$0xff]   ;;  %v746_v2 = vld [vmem:[%s1109_s1 + $0x10] sm:$0xff]  }
  0x50   :  { %662 = vmatprep.subr.bf16.mxu0 %v929_v0  ;;  %670 = vmatprep.mubr.msk.bf16.mxu0 %vm930_vm0, %v929_v0  ;;  %v747_v3 = vld [vmem:[%s1109_s1 + $0x8] sm:$0xff]   ;;  %vm153_vm1 = vcmask 523264   ;;  %v748_v4 = vld [vmem:[%s1109_s1] sm:$0xff]   ;;  %vm222_vm2 = vcmask 261120   ;;  %v751_v15 = vld [vmem:[%s1113_s5 + $0x18] sm:$0xff]  }
  0x51   :  { %674 = vmatprep.subr.bf16.mxu1 %v929_v0  ;;  %678 = vmatprep.mubr.msk.bf16.mxu1 %vm930_vm0, %v929_v0  ;;  %v112_v5 = vld [vmem:[%s1108_s0] sm:$0x3]  ;;  %v749_v7 = vld [vmem:[%s1111_s3 + $0x8] sm:$0xff]   ;;  %v752_v18 = vld [vmem:[%s1113_s5 + $0x10] sm:$0xff]  }
  0x52   :  { %663 = vmatpush3.bf16.msra.mxu0 %v745_v1  ;;  %v113_v6 = vpack.c.bf16 %v112_v5, %v112_v5  ;;  %675 = vmatpush3.bf16.msra.mxu1 %v749_v7  ;;  %v750_v8 = vld [vmem:[%s1111_s3] sm:$0xff]   ;;  %v753_v19 = vld [vmem:[%s1113_s5 + $0x8] sm:$0xff]   ;;  %v755_v21 = vld [vmem:[%s1115_s7 + $0x38] sm:$0xff]  }
  0x53   :  { %664 = vmatprep.subr.bf16.mxu0 %v929_v0  ;;  %676 = vmatprep.subr.bf16.mxu1 %v929_v0  ;;  %v597_v9 = vld [vmem:[#allocation2] ss:$0 sm:$0xff]  ;;  %v756_v22 = vld [vmem:[%s1115_s7 + $0x30] sm:$0xff]   ;;  %v757_v23 = vld [vmem:[%s1115_s7 + $0x28] sm:$0xff]  }
  0x54   :  { %v754_v20 = vld [vmem:[%s1113_s5] sm:$0xff]   ;;  %v759_v25 = vld [vmem:[%s1115_s7 + $0x18] sm:$0xff]   ;;  %v760_v26 = vld [vmem:[%s1115_s7 + $0x10] sm:$0xff]  }
  0x55   :  { %v758_v24 = vld [vmem:[%s1115_s7 + $0x20] sm:$0xff]   ;;  %v761_v36 = vld [vmem:[%s1115_s7 + $0x8] sm:$0xff]   ;;  %v764_v39 = vld [vmem:[#allocation10 + $0x30] sm:$0xff]  }
  0x56   :  { %665 = vmatpush3.bf16.msra.mxu0 %v746_v2  ;;  %677 = vmatpush3.bf16.msra.mxu1 %v750_v8  ;;  %v603_v27 = vld [vmem:[#allocation5] ss:$0 sm:$0xff]  ;;  %v765_v40 = vld [vmem:[#allocation10 + $0x28] sm:$0xff]   ;;  %v766_v41 = vld [vmem:[#allocation10 + $0x20] sm:$0xff]  }
  0x57   :  { %666 = vmatprep.subr.bf16.mxu0 %v929_v0  ;;  %682 = vmatprep.subr.bf16.mxu1 %v929_v0  ;;  %v762_v37 = vld [vmem:[%s1115_s7] sm:$0xff]   ;;  %v768_v43 = vld [vmem:[#allocation10 + $0x10] sm:$0xff]   ;;  %v769_v52 = vld [vmem:[#allocation10 + $0x8] sm:$0xff]   ;;  %s931_s7 = smov [#allocation13]  }
  0x58   :  { %v763_v38 = vld [vmem:[#allocation10 + $0x38] sm:$0xff]   ;;  %v770_v53 = vld [vmem:[#allocation10] sm:$0xff]   ;;  %s585_s8 = sshll.u32 %s931_s7, 4  ;;  %s586_s8 = int_to_ptr.vmem [resolvable:$true] %s585_s8 }
  0x59   :  { %v767_v42 = vld [vmem:[#allocation10 + $0x18] sm:$0xff]   ;;  %v622_v63 = vld [vmem:[#allocation11] ss:$0 sm:$0xff]  ;;  %s891_s18 = scalar_lea.vmem %s586_s8, 32  ;;  %p896_p3 = scmp.lt.s32.totalorder %s586_s8, %s586_s8 }
  0x5a   :  { %667 = vmatpush3.bf16.msra.mxu0 %v747_v3  ;;  %v607_v44 = vld [vmem:[#allocation7] ss:$0 sm:$0xff]  ;;  %v613_v54 = vld [vmem:[#allocation8] ss:$0 sm:$0xff]  ;;  %p892_p2 = scmp.ne.s32.totalorder %s586_s8, %s891_s18  ;;  %p897_p4 = scmp.lt.s32.totalorder %s891_s18, %s891_s18 }
  0x5b   :  { %668 = vmatprep.subr.bf16.mxu0 %v929_v0 }
  0x5c   :  { %p898_p5 = por %p897_p4, %p896_p3 }
  0x5e   :  { %669 = vmatpush3.bf16.msra.mxu0 %v748_v4  ;;  %p899_p6 = pnand %p898_p5, %p892_p2 }
  0x5f   :  { %694 = vmatprep.subr.bf16.mxu0 %v929_v0 }
  0x61   :  { %671 = vmatmul.mubr.msk.bf16.vlgmr.msra.gmra.mxu0 %vm153_vm1, %v113_v6 }
  0x62   :  { %710 = vmatprep.mubr.msk.bf16.mxu0 %vm930_vm0, %v929_v0  ;;  %695 = vmatpush3.bf16.msra.mxu0 %v755_v21 }
  0x63   :  { %696 = vmatprep.subr.bf16.mxu0 %v929_v0 }
  0x66   :  { %697 = vmatpush3.bf16.msra.mxu0 %v756_v22 }
  0x67   :  { %698 = vmatprep.subr.bf16.mxu0 %v929_v0 }
  0x6a   :  { %699 = vmatpush3.bf16.msra.mxu0 %v757_v23 }
  0x6b   :  { %700 = vmatprep.subr.bf16.mxu0 %v929_v0 }
  0x6e   :  { %701 = vmatpush3.bf16.msra.mxu0 %v758_v24 }
  0x6f   :  { %702 = vmatprep.subr.bf16.mxu0 %v929_v0 }
  0x72   :  { %703 = vmatpush3.bf16.msra.mxu0 %v759_v25 }
  0x73   :  { %704 = vmatprep.subr.bf16.mxu0 %v929_v0 }
  0x76   :  { %705 = vmatpush3.bf16.msra.mxu0 %v760_v26 }
  0x77   :  { %706 = vmatprep.subr.bf16.mxu0 %v929_v0 }
  0x7a   :  { %707 = vmatpush3.bf16.msra.mxu0 %v761_v36 }
  0x7b   :  { %708 = vmatprep.subr.bf16.mxu0 %v929_v0 }
  0x7e   :  { %709 = vmatpush3.bf16.msra.mxu0 %v762_v37 }
 0x121   :  { %v191_v10 = vpop.f32.mrf.mxu0 }
 0x122   :  { %v192_v11 = vadd.f32 %v597_v9, %v191_v10 }
 0x123   :  { %v672_v12 = vpop.f32.mrf.mxu0 }
 0x124   :  { %v197_v13 = vmax.f32 %v192_v11, 0.0 }
 0x125   :  { %v194_v14 = vpop.f32.mrf.mxu0 }
 0x126   :  { %v198_v16 = vpack.c.bf16 %v197_v13, %v197_v13 }
 0x127   :  { %v673_v17 = vpop.f32.mrf.mxu0 }
 0x128   :  { %679 = vmatmul.mubr.msk.bf16.vlgmr.msra.gmra.mxu1 %vm222_vm2, %v198_v16 }
 0x129   :  { %683 = vmatpush3.bf16.msra.mxu1 %v751_v15  ;;  %690 = vmatprep.mubr.msk.bf16.mxu1 %vm930_vm0, %v929_v0 }
 0x12a   :  { %684 = vmatprep.subr.bf16.mxu1 %v929_v0 }
 0x12d   :  { %685 = vmatpush3.bf16.msra.mxu1 %v752_v18 }
 0x12e   :  { %686 = vmatprep.subr.bf16.mxu1 %v929_v0 }
 0x131   :  { %687 = vmatpush3.bf16.msra.mxu1 %v753_v19 }
 0x132   :  { %688 = vmatprep.subr.bf16.mxu1 %v929_v0 }
 0x135   :  { %689 = vmatpush3.bf16.msra.mxu1 %v754_v20 }
 0x136   :  { %714 = vmatprep.subr.bf16.mxu1 %v929_v0 }
 0x1e8   :  { %v260_v28 = vpop.f32.mrf.mxu1 }
 0x1e9   :  { %v261_v29 = vadd.f32 %v603_v27, %v260_v28 }
 0x1ea   :  { %v680_v30 = vpop.f32.mrf.mxu1 }
 0x1eb   :  { %v266_v31 = vmul.f32 0.1, %v261_v29 }
 0x1ec   :  { %v263_v32 = vpop.f32.mrf.mxu1 }
 0x1ed   :  { %v267_v33 = vmax.f32 %v261_v29, %v266_v31 }
 0x1ee   :  { %v681_v34 = vpop.f32.mrf.mxu1 }
 0x1ef   :  { %v268_v35 = vpack.c.bf16 %v267_v33, %v267_v33 }
 0x1f1   :  { %691 = vmatmul.mubr.msk.bf16.vlgmr.msra.gmra.mxu1 %vm153_vm1, %v268_v35 }
 0x1f2   :  { %730 = vmatprep.mubr.msk.bf16.mxu1 %vm930_vm0, %v929_v0  ;;  %715 = vmatpush3.bf16.msra.mxu1 %v763_v38 }
 0x1f3   :  { %716 = vmatprep.subr.bf16.mxu1 %v929_v0 }
 0x1f6   :  { %717 = vmatpush3.bf16.msra.mxu1 %v764_v39 }
 0x1f7   :  { %718 = vmatprep.subr.bf16.mxu1 %v929_v0 }
 0x1fa   :  { %719 = vmatpush3.bf16.msra.mxu1 %v765_v40 }
 0x1fb   :  { %720 = vmatprep.subr.bf16.mxu1 %v929_v0 }
 0x1fe   :  { %721 = vmatpush3.bf16.msra.mxu1 %v766_v41 }
 0x1ff   :  { %722 = vmatprep.subr.bf16.mxu1 %v929_v0 }
 0x202   :  { %723 = vmatpush3.bf16.msra.mxu1 %v767_v42 }
 0x203   :  { %724 = vmatprep.subr.bf16.mxu1 %v929_v0 }
 0x206   :  { %725 = vmatpush3.bf16.msra.mxu1 %v768_v43 }
 0x207   :  { %726 = vmatprep.subr.bf16.mxu1 %v929_v0 }
 0x20a   :  { %727 = vmatpush3.bf16.msra.mxu1 %v769_v52 }
 0x20b   :  { %728 = vmatprep.subr.bf16.mxu1 %v929_v0 }
 0x20e   :  { %729 = vmatpush3.bf16.msra.mxu1 %v770_v53 }
 0x2b1   :  { %v345_v45 = vpop.f32.mrf.mxu1 }
 0x2b2   :  { %v346_v46 = vadd.f32 %v607_v44, %v345_v45 }
 0x2b3   :  { %v692_v47 = vpop.f32.mrf.mxu1 }
 0x2b4   :  { %v351_v48 = vmax.f32 %v346_v46, 0.0 }
 0x2b5   :  { %v348_v49 = vpop.f32.mrf.mxu1 }
 0x2b6   :  { %v352_v50 = vpack.c.bf16 %v351_v48, %v351_v48 }
 0x2b7   :  { %v693_v51 = vpop.f32.mrf.mxu1 }
 0x2b8   :  { %711 = vmatmul.mubr.bf16.vlgmr.msra.gmra.mxu0 %v352_v50 }
 0x378   :  { %v458_v55 = vpop.f32.mrf.mxu0 }
 0x379   :  { %v459_v56 = vadd.f32 %v613_v54, %v458_v55 }
 0x37a   :  { %v712_v57 = vpop.f32.mrf.mxu0 }
 0x37b   :  { %v464_v58 = vmul.f32 0.1, %v459_v56 }
 0x37c   :  { %v461_v59 = vpop.f32.mrf.mxu0 }
 0x37d   :  { %v465_v60 = vmax.f32 %v459_v56, %v464_v58 }
 0x37e   :  { %v713_v61 = vpop.f32.mrf.mxu0 }
 0x37f   :  { %v466_v62 = vpack.c.bf16 %v465_v60, %v465_v60 }
 0x381   :  { %731 = vmatmul.mubr.bf16.vlgmr.msra.gmra.mxu1 %v466_v62 }
 0x441   :  { %v572_v1 = vpop.f32.mrf.mxu1 }
 0x442   :  { %v573_v2 = vadd.f32 %v622_v63, %v572_v1 }
 0x443   :  { %v732_v3 = vpop.f32.mrf.mxu1 }
 0x444   :  { %578 = vst [vmem:[#allocation13] sm:$0x3] %v573_v2 }
 0x445   :  { %v575_v0 = vpop.f32.mrf.mxu1 }
 0x446   :  { %902 = shalt.err (!%p899_p6)
}
 0x447   :  { %588 = dma.vmem_to_hbm [thread:$0]  %s586_s8, 32, %s1119_s11, [#allocation4]   ;;  %v733_v4 = vpop.f32.mrf.mxu1 }
 0x448   :  { %919 = dma.done.wait [#allocation4], 32  }
 0x449   :  { %920 = vsyncadd [#allocation4], 4294967264 }
 0x44a   :  { %592 = vsyncpa [#allocation3], 1 }
 0x44b   :  { %593 = vsyncpa [#allocation6], 1 }
 0x44c   :  { %594 = vsyncpa [#allocation9], 1 }
 0x44d   :  { %595 = vsyncpa [#allocation12], 1 }
 0x44e   :  { %596 = vsyncpa [#allocation4], 1 }

</bundles_post_ra>
